<compile_context>
chip_gen: v6e
topology: v6e:2x2x1
jax: 0.10.0
libtpu: 0.0.40
codegen_flags: <defaults>
</compile_context>

<pallas_src>
import functools

import jax
import jax.numpy as jnp
from jax.experimental import pallas as pl
from jax.experimental.pallas import tpu as pltpu


def _round_up(x, m):
    return ((x + m - 1) // m) * m


def _cdiv(a, b):
    return -(-a // b)


def _normal_loss_kernel(w_ref, gt_ref, pred_ref, loss_ref, acc_w, acc_d, *,
                        lambda_nr_spv, n_rays, n_w_elems, n_n_elems,
                        tile_rows, sub_rows, n_chunks, ragged):
    i = pl.program_id(0)

    @pl.when(i == 0)
    def _():
        acc_w[...] = jnp.zeros_like(acc_w)
        acc_d[...] = jnp.zeros_like(acc_d)

    def accumulate(r0):
        # Sub-chunk of rows: keeps cast / diff temporaries small while the DMA
        # block (tile_rows) stays large.
        w = w_ref[pl.ds(r0, sub_rows), :].astype(jnp.float32)
        gt = gt_ref[pl.ds(r0, sub_rows), :].astype(jnp.float32)
        pr = pred_ref[pl.ds(r0, sub_rows), :].astype(jnp.float32)
        diff = jnp.abs(gt - pr)
        if ragged:
            # Edge blocks past the true array extent contain garbage; mask by
            # global row index.  Columns are always fully valid (block lane dim
            # equals the full array dim).
            row = (i * tile_rows + r0
                   + jax.lax.broadcasted_iota(jnp.int32, (sub_rows, 1), 0))
            valid = row < n_rays
            w = jnp.where(valid, w, 0.0)
            diff = jnp.where(valid, diff, 0.0)
        # Pure VPU adds into per-lane accumulators (tiny XLU tail per chunk).
        acc_w[...] += jnp.sum(w, axis=0, keepdims=True)
        acc_d[...] += jnp.sum(diff, axis=0, keepdims=True)

    if n_chunks == 1:
        accumulate(0)
    else:
        def body(c, carry):
            accumulate(pl.multiple_of(c * sub_rows, 8))
            return carry
        jax.lax.fori_loop(0, n_chunks, body, 0)

    @pl.when(i == pl.num_programs(0) - 1)
    def _():
        mean_w = jnp.sum(acc_w[...]) / n_w_elems
        l1 = jnp.sum(acc_d[...]) / n_n_elems
        loss_ref[0] = lambda_nr_spv * mean_w * l1


def normal_loss(weights, normal_gt, normal_pred, lambda_nr_spv=0.001,
                keyword='an_lr', *,
                _step_phys_bytes=16 * 1024 * 1024,
                _sub_chunk_phys_bytes=1 * 1024 * 1024,
                _small_total_bytes=4 * 1024 * 1024):
    """Pallas implementation of NormalLoss.forward for keyword='an_lr'.

    weights:     [N_rays, N_samples]
    normal_gt:   [N_rays, N_samples, 3]
    normal_pred: [N_rays, N_samples, 3]
    Returns (loss, loss_dict) like the PyTorch module.
    """
    if keyword != 'an_lr':
        # TODO(synk): subset path (np.where on target_valid_depth + masked L1)
        # is data-dependent filtering and references an undefined
        # `target_depth` in the original code; not implemented here.
        raise NotImplementedError("only keyword='an_lr' is implemented")

    n_rays, n_samples = weights.shape
    assert normal_gt.shape == (n_rays, n_samples, 3)
    assert normal_pred.shape == (n_rays, n_samples, 3)

    lane_w = n_samples
    lane_n = 3 * n_samples
    n_w = n_rays * n_samples           # original weight element count
    n_n = n_w * 3                      # original normal element count

    # Free bitcast reshapes — no data movement, no padding pre-pass.
    gt2d = normal_gt.reshape(n_rays, lane_n)
    pred2d = normal_pred.reshape(n_rays, lane_n)

    # ---- Tile sizing against *physical* VMEM footprint (lanes pad to 128). --
    isz_w = jnp.dtype(weights.dtype).itemsize
    isz_g = jnp.dtype(normal_gt.dtype).itemsize
    isz_p = jnp.dtype(normal_pred.dtype).itemsize
    phys_row = (isz_w * _round_up(lane_w, 128)
                + isz_g * _round_up(lane_n, 128)
                + isz_p * _round_up(lane_n, 128))
    total_phys = n_rays * phys_row

    if total_phys <= _small_total_bytes or n_rays < 16:
        # Everything fits in one comfortable block: no masking, no chunking.
        tile_rows, sub_rows, n_chunks, grid_steps = n_rays, n_rays, 1, 1
    else:
        rows_floor = (n_rays // 8) * 8
        sub_rows = min(max(8, _round_up(_sub_chunk_phys_bytes // phys_row, 8)),
                       rows_floor)
        n_chunks = max(1, min(_step_phys_bytes // (sub_rows * phys_row),
                              rows_floor // sub_rows))
        tile_rows = sub_rows * n_chunks          # multiple of 8, <= n_rays
        grid_steps = _cdiv(n_rays, tile_rows)
    ragged = (grid_steps * tile_rows != n_rays)

    kernel = functools.partial(
        _normal_loss_kernel,
        lambda_nr_spv=float(lambda_nr_spv),
        n_rays=int(n_rays),
        n_w_elems=float(n_w),
        n_n_elems=float(n_n),
        tile_rows=int(tile_rows),
        sub_rows=int(sub_rows),
        n_chunks=int(n_chunks),
        ragged=bool(ragged),
    )

    hbm_bytes = n_w * isz_w + n_n * (isz_g + isz_p)

    loss = pl.pallas_call(
        kernel,
        out_shape=jax.ShapeDtypeStruct((1,), jnp.float32),
        grid_spec=pltpu.PrefetchScalarGridSpec(
            num_scalar_prefetch=0,
            grid=(grid_steps,),
            in_specs=[
                pl.BlockSpec((tile_rows, lane_w), lambda i: (i, 0)),
                pl.BlockSpec((tile_rows, lane_n), lambda i: (i, 0)),
                pl.BlockSpec((tile_rows, lane_n), lambda i: (i, 0)),
            ],
            out_specs=pl.BlockSpec(memory_space=pltpu.MemorySpace.SMEM),
            scratch_shapes=[pltpu.VMEM((1, lane_w), jnp.float32),
                            pltpu.VMEM((1, lane_n), jnp.float32)],
        ),
        compiler_params=pltpu.CompilerParams(
            dimension_semantics=("arbitrary",),     # accumulator carried
            vmem_limit_bytes=48 * 1024 * 1024,      # > v5e 16 MiB default, < v7x 64 MiB physical
        ),
        cost_estimate=pl.CostEstimate(
            flops=3 * n_n + n_w,
            transcendentals=0,
            bytes_accessed=int(hbm_bytes),
        ),
    )(weights, gt2d, pred2d)[0]

    loss_dict = {'coarse_nrspv_an_lr': loss}
    return loss, loss_dict


if __name__ == "__main__":
    key = jax.random.PRNGKey(0)
    k_w, k_gt, k_pred, k_w2, k_gt2, k_pred2 = jax.random.split(key, 6)

    def _unit(v):
        return v / (jnp.linalg.norm(v, axis=-1, keepdims=True) + 1e-8)

    def _ref_loss(w, gt, pred, lam):
        return lam * jnp.mean(w) * jnp.mean(jnp.abs(gt - pred))

    lam = 0.001

    # Case 1: small shape — single-step, unmasked path.
    n_rays, n_samples = 8, 16
    weights = jax.random.uniform(k_w, (n_rays, n_samples), dtype=jnp.float32)
    normal_gt = _unit(jax.random.normal(k_gt, (n_rays, n_samples, 3),
                                        dtype=jnp.float32))
    normal_pred = _unit(jax.random.normal(k_pred, (n_rays, n_samples, 3),
                                          dtype=jnp.float32))
    loss, loss_dict = normal_loss(weights, normal_gt, normal_pred,
                                  lambda_nr_spv=lam)
    loss = jax.block_until_ready(loss)
    ref = _ref_loss(weights, normal_gt, normal_pred, lam)
    assert jnp.allclose(loss, ref, rtol=1e-5, atol=1e-8), (loss, ref)
    assert jnp.allclose(loss_dict['coarse_nrspv_an_lr'], ref,
                        rtol=1e-5, atol=1e-8)

    # Case 2: shrink the tiling budgets to force the multi-step / in-kernel
    # chunked / ragged-masked path at a small shape (exercises edge-block mask).
    n_rays2, n_samples2 = 1000, 12
    weights2 = jax.random.uniform(k_w2, (n_rays2, n_samples2),
                                  dtype=jnp.float32)
    gt2 = _unit(jax.random.normal(k_gt2, (n_rays2, n_samples2, 3),
                                  dtype=jnp.float32))
    pred2 = _unit(jax.random.normal(k_pred2, (n_rays2, n_samples2, 3),
                                    dtype=jnp.float32))
    loss2, _ = normal_loss(weights2, gt2, pred2, lambda_nr_spv=lam,
                           _step_phys_bytes=256 * 1024,
                           _sub_chunk_phys_bytes=64 * 1024,
                           _small_total_bytes=0)
    loss2 = jax.block_until_ready(loss2)
    ref2 = _ref_loss(weights2, gt2, pred2, lam)
    assert jnp.allclose(loss2, ref2, rtol=1e-5, atol=1e-8), (loss2, ref2)

    print("KERNEL_OK")
</pallas_src>

<mosaic_0001>
module attributes {stable_mosaic.version = 11 : i64} {
  func.func @_normal_loss_kernel(%arg0: i32, %arg1: memref<8x16xf32, #tpu.memory_space<vmem>>, %arg2: memref<8x48xf32, #tpu.memory_space<vmem>>, %arg3: memref<8x48xf32, #tpu.memory_space<vmem>>, %arg4: memref<1xf32, #tpu.memory_space<smem>>, %arg5: memref<1x16xf32, #tpu.memory_space<vmem>>, %arg6: memref<1x48xf32, #tpu.memory_space<vmem>>) attributes {dimension_semantics = [#tpu.dimension_semantics<arbitrary>], iteration_bounds = array<i64: 1>, scalar_prefetch = 0 : i64, scratch_operands = 2 : i64, tpu.core_type = #tpu.core_type<tc>, window_params = [{transform_indices = @transform_0, window_bounds = array<i64: 8, 16>}, {transform_indices = @transform_1, window_bounds = array<i64: 8, 48>}, {transform_indices = @transform_2, window_bounds = array<i64: 8, 48>}, {transform_indices = @transform_3, window_bounds = array<i64: 1>}]} {
    %c0_i32 = arith.constant 0 : i32
    %0 = arith.cmpi eq, %arg0, %c0_i32 : i32
    %1 = arith.extui %0 : i1 to i32
    %c0_i32_0 = arith.constant 0 : i32
    %2 = arith.cmpi ne, %1, %c0_i32_0 : i32
    scf.if %2 {
      %cst_17 = arith.constant 0.000000e+00 : f32
      %21 = vector.broadcast %cst_17 : f32 to vector<1x16xf32>
      %c0_18 = arith.constant 0 : index
      %c0_19 = arith.constant 0 : index
      %22 = vector.load %arg5[%c0_18, %c0_19] : memref<1x16xf32, #tpu.memory_space<vmem>>, vector<1x16xf32>
      tpu.vector_store %arg5[%c0_18, %c0_19], %21 {strides = array<i32>} : memref<1x16xf32, #tpu.memory_space<vmem>>, vector<1x16xf32>,
      %cst_20 = arith.constant 0.000000e+00 : f32
      %23 = vector.broadcast %cst_20 : f32 to vector<1x48xf32>
      %c0_21 = arith.constant 0 : index
      %c0_22 = arith.constant 0 : index
      %24 = vector.load %arg6[%c0_21, %c0_22] : memref<1x48xf32, #tpu.memory_space<vmem>>, vector<1x48xf32>
      tpu.vector_store %arg6[%c0_21, %c0_22], %23 {strides = array<i32>} : memref<1x48xf32, #tpu.memory_space<vmem>>, vector<1x48xf32>,
    } else {
    }
    %c0 = arith.constant 0 : index
    %c0_1 = arith.constant 0 : index
    %3 = vector.load %arg1[%c0, %c0_1] : memref<8x16xf32, #tpu.memory_space<vmem>>, vector<8x16xf32>
    %c0_2 = arith.constant 0 : index
    %c0_3 = arith.constant 0 : index
    %4 = vector.load %arg2[%c0_2, %c0_3] : memref<8x48xf32, #tpu.memory_space<vmem>>, vector<8x48xf32>
    %c0_4 = arith.constant 0 : index
    %c0_5 = arith.constant 0 : index
    %5 = vector.load %arg3[%c0_4, %c0_5] : memref<8x48xf32, #tpu.memory_space<vmem>>, vector<8x48xf32>
    %6 = arith.subf %4, %5 : vector<8x48xf32>
    %7 = math.absf %6 : vector<8x48xf32>
    %c0_6 = arith.constant 0 : index
    %c0_7 = arith.constant 0 : index
    %8 = vector.load %arg5[%c0_6, %c0_7] : memref<1x16xf32, #tpu.memory_space<vmem>>, vector<1x16xf32>
    %cst = arith.constant dense<0.000000e+00> : vector<16xf32>
    %9 = vector.multi_reduction <add>, %3, %cst [0] : vector<8x16xf32> to vector<16xf32>
    %10 = vector.shape_cast %9 : vector<16xf32> to vector<1x16xf32>
    %11 = arith.addf %8, %10 : vector<1x16xf32>
    %c0_8 = arith.constant 0 : index
    %c0_9 = arith.constant 0 : index
    %12 = vector.load %arg5[%c0_8, %c0_9] : memref<1x16xf32, #tpu.memory_space<vmem>>, vector<1x16xf32>
    tpu.vector_store %arg5[%c0_8, %c0_9], %11 {strides = array<i32>} : memref<1x16xf32, #tpu.memory_space<vmem>>, vector<1x16xf32>,
    %c0_10 = arith.constant 0 : index
    %c0_11 = arith.constant 0 : index
    %13 = vector.load %arg6[%c0_10, %c0_11] : memref<1x48xf32, #tpu.memory_space<vmem>>, vector<1x48xf32>
    %cst_12 = arith.constant dense<0.000000e+00> : vector<48xf32>
    %14 = vector.multi_reduction <add>, %7, %cst_12 [0] : vector<8x48xf32> to vector<48xf32>
    %15 = vector.shape_cast %14 : vector<48xf32> to vector<1x48xf32>
    %16 = arith.addf %13, %15 : vector<1x48xf32>
    %c0_13 = arith.constant 0 : index
    %c0_14 = arith.constant 0 : index
    %17 = vector.load %arg6[%c0_13, %c0_14] : memref<1x48xf32, #tpu.memory_space<vmem>>, vector<1x48xf32>
    tpu.vector_store %arg6[%c0_13, %c0_14], %16 {strides = array<i32>} : memref<1x48xf32, #tpu.memory_space<vmem>>, vector<1x48xf32>,
    %c0_i32_15 = arith.constant 0 : i32
    %18 = arith.cmpi eq, %arg0, %c0_i32_15 : i32
    %19 = arith.extui %18 : i1 to i32
    %c0_i32_16 = arith.constant 0 : i32
    %20 = arith.cmpi ne, %19, %c0_i32_16 : i32
    scf.if %20 {
      %c0_17 = arith.constant 0 : index
      %c0_18 = arith.constant 0 : index
      %21 = vector.load %arg5[%c0_17, %c0_18] : memref<1x16xf32, #tpu.memory_space<vmem>>, vector<1x16xf32>
      %22 = vector.shape_cast %21 : vector<1x16xf32> to vector<1x1x16xf32>
      %cst_19 = arith.constant dense<0.000000e+00> : vector<1xf32>
      %23 = vector.multi_reduction <add>, %22, %cst_19 [1, 2] : vector<1x1x16xf32> to vector<1xf32>
      %24 = vector.shape_cast %23 : vector<1xf32> to vector<1x1x1xf32>
      %25 = vector.extract %24[0, 0, 0] : f32 from vector<1x1x1xf32>
      %cst_20 = arith.constant 1.280000e+02 : f32
      %26 = arith.divf %25, %cst_20 : f32
      %c0_21 = arith.constant 0 : index
      %c0_22 = arith.constant 0 : index
      %27 = vector.load %arg6[%c0_21, %c0_22] : memref<1x48xf32, #tpu.memory_space<vmem>>, vector<1x48xf32>
      %28 = vector.shape_cast %27 : vector<1x48xf32> to vector<1x1x48xf32>
      %cst_23 = arith.constant dense<0.000000e+00> : vector<1xf32>
      %29 = vector.multi_reduction <add>, %28, %cst_23 [1, 2] : vector<1x1x48xf32> to vector<1xf32>
      %30 = vector.shape_cast %29 : vector<1xf32> to vector<1x1x1xf32>
      %31 = vector.extract %30[0, 0, 0] : f32 from vector<1x1x1xf32>
      %cst_24 = arith.constant 3.840000e+02 : f32
      %32 = arith.divf %31, %cst_24 : f32
      %cst_25 = arith.constant 1.000000e-03 : f32
      %33 = arith.mulf %cst_25, %26 : f32
      %34 = arith.mulf %33, %32 : f32
      %c0_26 = arith.constant 0 : index
      %35 = memref.load %arg4[%c0_26] : memref<1xf32, #tpu.memory_space<smem>>
      memref.store %34, %arg4[%c0_26] : memref<1xf32, #tpu.memory_space<smem>>
    } else {
    }
    return
  }
  func.func @transform_0(%arg0: i32) -> (i32, i32) {
    %c0_i32 = arith.constant 0 : i32
    %c0_i32_0 = arith.constant 0 : i32
    return %arg0, %c0_i32 : i32, i32
  }
  func.func @transform_1(%arg0: i32) -> (i32, i32) {
    %c0_i32 = arith.constant 0 : i32
    %c0_i32_0 = arith.constant 0 : i32
    return %arg0, %c0_i32 : i32, i32
  }
  func.func @transform_2(%arg0: i32) -> (i32, i32) {
    %c0_i32 = arith.constant 0 : i32
    %c0_i32_0 = arith.constant 0 : i32
    return %arg0, %c0_i32 : i32, i32
  }
  func.func @transform_3(%arg0: i32) -> i32 {
    %c0_i32 = arith.constant 0 : i32
    %c0_i32_0 = arith.constant 0 : i32
    return %c0_i32 : i32
  }
}

</mosaic_0001>

<bundles_post_ra>
// kernel: tpu_custom_call.1
= control target key start
LH: loop header
LB: loop body
LE: loop exit
PB: predicated region body
PF: predicated region fallthrough
CT: control target
= control target key end

     0   :  { %8 = vsyncpa [#allocation5], 0  ;;  %s263_s0 = inlined_call_operand.hbm [shape: f32[8,16], index: 0, kind: input, shape index: {}]   ;;  %s264_s1 = inlined_call_operand.hbm [shape: f32[8,48], index: 1, kind: input, shape index: {}]   ;;  %s265_s2 = inlined_call_operand.hbm [shape: f32[8,48], index: 2, kind: input, shape index: {}]   ;;  %s266_s3 = inlined_call_operand.hbm [shape: f32[1], index: 3, kind: output, shape index: {}]  }
   0x1   :  { %9 = vsyncpa [#allocation8], 0 }
   0x2   :  { %10 = vsyncpa [#allocation6], 0  ;;  %s220_s12 = smov [#allocation7]   ;;  %s221_s14 = smov [#allocation4]  }
   0x3   :  { %s27_s13 = sshll.u32 %s220_s12, 4  ;;  %s17_s15 = sshll.u32 %s221_s14, 4  ;;  %s28_s13 = int_to_ptr.vmem [resolvable:$true] %s27_s13  ;;  %s18_s15 = int_to_ptr.vmem [resolvable:$true] %s17_s15 }
   0x4   :  { %s154_s16 = scalar_lea.vmem %s28_s13, 128  ;;  %p159_p1 = scmp.lt.s32.totalorder %s28_s13, %s28_s13 }
   0x5   :  { %p155_p0 = scmp.ne.s32.totalorder %s28_s13, %s154_s16  ;;  %p160_p2 = scmp.lt.s32.totalorder %s154_s16, %s154_s16 }
   0x7   :  { %p161_p3 = por %p160_p2, %p159_p1 }
   0x9   :  { %p162_p4 = pnand %p161_p3, %p155_p0 }
   0xb   :  { %165 = shalt.err (!%p162_p4)
}
   0xc   :  { %30 = dma.hbm_to_vmem [thread:$0]  %s264_s1, 128, %s28_s13, [#allocation8]  }
   0xd   :  { %s174_s19 = scalar_lea.vmem %s18_s15, 128  ;;  %p179_p6 = scmp.lt.s32.totalorder %s18_s15, %s18_s15 }
   0xe   :  { %p175_p5 = scmp.ne.s32.totalorder %s18_s15, %s174_s19  ;;  %p180_p7 = scmp.lt.s32.totalorder %s174_s19, %s174_s19 }
  0x10   :  { %p181_p8 = por %p180_p7, %p179_p6 }
  0x12   :  { %p182_p9 = pnand %p181_p8, %p175_p5 }
  0x14   :  { %185 = shalt.err (!%p182_p9)
}
  0x15   :  { %20 = dma.hbm_to_vmem [thread:$0]  %s263_s0, 128, %s18_s15, [#allocation5]  }
  0x16   :  { %s222_s22 = smov [#allocation9]  }
  0x17   :  { %s37_s23 = sshll.u32 %s222_s22, 4  ;;  %s38_s23 = int_to_ptr.vmem [resolvable:$true] %s37_s23 }
  0x18   :  { %s194_s24 = scalar_lea.vmem %s38_s23, 128  ;;  %p199_p11 = scmp.lt.s32.totalorder %s38_s23, %s38_s23 }
  0x19   :  { %p195_p10 = scmp.ne.s32.totalorder %s38_s23, %s194_s24  ;;  %p200_p12 = scmp.lt.s32.totalorder %s194_s24, %s194_s24 }
  0x1b   :  { %p201_p13 = por %p200_p12, %p199_p11 }
  0x1d   :  { %p202_p0 = pnand %p201_p13, %p195_p10 }
  0x1f   :  { %205 = shalt.err (!%p202_p0)
}
  0x20   :  { %40 = dma.hbm_to_vmem [thread:$0]  %s265_s2, 128, %s38_s23, [#allocation8]  }
  0x21   :  { %214 = dma.done.wait [#allocation5], 128  }
  0x22   :  { %215 = vsyncadd [#allocation5], 4294967168 }
  0x23   :  { %216 = dma.done.wait [#allocation8], 256  }
  0x24   :  { %217 = vsyncadd [#allocation8], 4294967040  ;;  %vm54_vm0 = vcmask 122880   ;;  %vm56_vm1 = vcmask 385024   ;;  %v223_v0 = vmov 0.0   ;;  %vm64_vm2 = vcmask 130048  }
  0x25   :  { %55 = vst.msk [vmem:[#allocation2] sm:$0x1] %vm54_vm0, %v223_v0  ;;  %v58_v1 = vld [vmem:[#allocation4] sm:$0xff]  ;;  %v59_v2 = vld [vmem:[#allocation7] sm:$0xff]  ;;  %v60_v3 = vld [vmem:[#allocation9] sm:$0xff]  ;;  %vm76_vm3 = vcmask 392192  }
  0x26   :  { %57 = vst.msk [vmem:[#allocation3] sm:$0x1] %vm56_vm1, %v223_v0  ;;  %v65_v4 = vsel %vm64_vm2, %v58_v1, 0.0  ;;  %v61_v5 = vsub.f32 %v59_v2, %v60_v3  ;;  %s224_s30 = smov [#allocation10]  }
  0x27   :  { %v66_v6 = vrot.slane %v65_v4, 4 }
  0x28   :  { %v62_v7 = vand.u32 2147483647, %v61_v5 }
  0x29   :  { %v67_v8 = vadd.f32 %v66_v6, %v65_v4 }
  0x2a   :  { %v77_v9 = vsel %vm76_vm3, %v62_v7, 0.0 }
  0x2b   :  { %v68_v10 = vrot.slane %v67_v8, 2  ;;  %v78_v11 = vrot.slane %v77_v9, 4 }
  0x2c   :  { %v63_v16 = vld [vmem:[#allocation2] sm:$0x1] }
  0x2d   :  { %v69_v12 = vadd.f32 %v68_v10, %v67_v8  ;;  %v79_v13 = vadd.f32 %v78_v11, %v77_v9  ;;  %v75_v21 = vld [vmem:[#allocation3] sm:$0x1] }
  0x2f   :  { %v70_v14 = vrot.slane %v69_v12, 1  ;;  %v80_v15 = vrot.slane %v79_v13, 2 }
  0x31   :  { %v71_v17 = vadd.f32 %v70_v14, %v69_v12  ;;  %v81_v18 = vadd.f32 %v80_v15, %v79_v13 }
  0x33   :  { %v72_v19 = vadd.f32 %v71_v17, %v63_v16  ;;  %v82_v20 = vrot.slane %v81_v18, 1 }
  0x35   :  { %74 = vst.msk [vmem:[#allocation2] sm:$0x1] %vm54_vm0, %v72_v19  ;;  %v83_v22 = vadd.f32 %v82_v20, %v81_v18 }
  0x37   :  { %v84_v23 = vadd.f32 %v83_v22, %v75_v21 }
  0x39   :  { %86 = vst.msk [vmem:[#allocation3] sm:$0x1] %vm56_vm1, %v84_v23 }
  0x3c   :  { %v90_v24 = vld [vmem:[#allocation2] sm:$0x1] }
  0x3d   :  { %v91_v25 = vsel %vm54_vm0, %v90_v24, 0.0 }
  0x3e   :  { %92 = vadd.xlane.f32.xlu0 %v91_v25 }
  0x40   :  { %v104_v26 = vld [vmem:[#allocation3] sm:$0x1] }
  0x41   :  { %v105_v27 = vsel %vm56_vm1, %v104_v26, 0.0 }
  0x42   :  { %106 = vadd.xlane.f32.xlu0 %v105_v27 }
  0xc7   :  { %v93_v28 = vpop.xlane.xlu0 %92 }
  0xc8   :  { %v94_v29 = vrot.slane %v93_v28, 4 }
  0xca   :  { %v95_v30 = vadd.f32 %v94_v29, %v93_v28 }
  0xcb   :  { %v107_v31 = vpop.xlane.xlu0 %106 }
  0xcc   :  { %v96_v32 = vrot.slane %v95_v30, 2  ;;  %v108_v33 = vrot.slane %v107_v31, 4 }
  0xce   :  { %v109_v34 = vadd.f32 %v108_v33, %v107_v31  ;;  %v97_v35 = vadd.f32 %v96_v32, %v95_v30 }
  0xd0   :  { %v110_v36 = vrot.slane %v109_v34, 2  ;;  %v98_v37 = vrot.slane %v97_v35, 1 }
  0xd2   :  { %v111_v38 = vadd.f32 %v110_v36, %v109_v34  ;;  %v99_v39 = vadd.f32 %v98_v37, %v97_v35 }
  0xd4   :  { %137 = vpush %v99_v39  ;;  %v112_v40 = vrot.slane %v111_v38, 1 }
  0xd6   :  { %v113_v41 = vadd.f32 %v112_v40, %v111_v38 }
  0xd8   :  { %139 = vpush %v113_v41 }
 0x105   :  { %s138_s0 = spop %137 }
 0x106   :  { %s103_s2 = smul.f32 0.0078125, %s138_s0 }
 0x108   :  { %s118_s26 = smul.f32 0.001, %s103_s2 }
 0x109   :  { %s140_s27 = spop %139 }
 0x10a   :  { %s117_s28 = smul.f32 0.0026041667, %s140_s27 }
 0x10c   :  { %s119_s29 = smul.f32 %s118_s26, %s117_s28 }
 0x10e   :  { %121 = sst [smem:[#allocation10]] %s119_s29 }
 0x10f   :  { %129 = dma.smem_to_hbm %s224_s30, 16, %s266_s3, [#allocation6]  }
 0x110   :  { %218 = dma.done.wait [#allocation6], 16  }
 0x111   :  { %219 = vsyncadd [#allocation6], 4294967280 }
 0x112   :  { %133 = sfence }
 0x113   :  { %134 = vsyncpa [#allocation5], 1 }
 0x114   :  { %135 = vsyncpa [#allocation8], 1 }
 0x115   :  { %136 = vsyncpa [#allocation6], 1 }

</bundles_post_ra>
